<compile_context>
chip_gen: v6e
topology: v6e:2x2x1
jax: 0.10.0
libtpu: 0.0.40
codegen_flags: <defaults>
</compile_context>

<pallas_src>
import functools

import jax
import jax.numpy as jnp
from jax.experimental import pallas as pl
from jax.experimental.pallas import tpu as pltpu


# ---------------------------------------------------------------------------
# Pallas kernel
# ---------------------------------------------------------------------------

def _fastest_block_kernel(x_ref, m1_ref, md_ref, m2_ref, b1_ref, bd_ref,
                          b2_ref, out_ref, xp_ref, mp_ref, *, stride):
    """One image per grid step.

    x_ref : (1, H, W*Cin)          image, rows flattened to W*Cin lanes
    m1_ref: (3, W*Cin, Wo*Cmid)    conv1 banded weights (one matrix per ky)
    md_ref: (3, W*Cin, Wo*Cout)    downsample-conv banded weights
    m2_ref: (3, Wo*Cmid, Wo*Cout)  conv2 banded weights
    b*_ref: (1, Wo*C)              BN-folded biases, tiled over Wo
    out_ref: (1, Ho, Wo*Cout)
    xp_ref : (H+2, W*Cin)    VMEM scratch, input padded in H
    mp_ref : (Ho+2, Wo*Cmid) VMEM scratch, conv1 output padded in H
    """
    H = x_ref.shape[1]
    WC = x_ref.shape[2]
    Ho = out_ref.shape[1]
    WoCm = m1_ref.shape[2]
    f32 = jnp.float32

    # H-pad the input into VMEM scratch: zero only the two border rows,
    # aligned (lane-offset-0) interior copy.
    xp_ref[0:1, :] = jnp.zeros((1, WC), f32)
    xp_ref[H + 1:H + 2, :] = jnp.zeros((1, WC), f32)
    xp_ref[1:H + 1, :] = x_ref[0]

    # conv1 + downsample conv (both folded with their BN): the three ky
    # row-slabs are loaded once and shared by both matmuls; biases initialize
    # the accumulators.
    rows0 = xp_ref[pl.ds(0, Ho, stride=stride), :]
    mid = jnp.dot(rows0, m1_ref[0], preferred_element_type=f32) + b1_ref[...]
    idn = jnp.dot(rows0, md_ref[0], preferred_element_type=f32) + bd_ref[...]
    for ky in (1, 2):
        rows = xp_ref[pl.ds(ky, Ho, stride=stride), :]
        mid = mid + jnp.dot(rows, m1_ref[ky], preferred_element_type=f32)
        idn = idn + jnp.dot(rows, md_ref[ky], preferred_element_type=f32)

    # ReLU after (folded, inference-mode) BN1.
    mid = jnp.maximum(mid, 0.0)

    # H-pad conv1 output for conv2 (W padding lives in the banded weights).
    mp_ref[0:1, :] = jnp.zeros((1, WoCm), f32)
    mp_ref[Ho + 1:Ho + 2, :] = jnp.zeros((1, WoCm), f32)
    mp_ref[1:Ho + 1, :] = mid

    # conv2 (stride 1) + folded BN2.
    r0 = mp_ref[pl.ds(0, Ho), :]
    out = jnp.dot(r0, m2_ref[0], preferred_element_type=f32) + b2_ref[...]
    for ky in (1, 2):
        rk = mp_ref[pl.ds(ky, Ho), :]
        out = out + jnp.dot(rk, m2_ref[ky], preferred_element_type=f32)

    # residual add + final ReLU; single lane-dense store (Wo*Cout lanes).
    out_ref[0] = jnp.maximum(out + idn, 0.0).astype(out_ref.dtype)


# ---------------------------------------------------------------------------
# Parameter glue (plain JAX): BN folding, banded weight construction, layout.
# ---------------------------------------------------------------------------

def _fold_bn(w_oihw, b, gamma, beta, mean, var, eps=1e-5):
    """Fold inference-mode BatchNorm into a conv's weight/bias.

    Returns weight in HWIO layout (3,3,Cin,Cout) and bias (Cout,).
    """
    scale = gamma / jnp.sqrt(var + eps)
    w_hwio = jnp.transpose(w_oihw, (2, 3, 1, 0))
    return w_hwio * scale[None, None, None, :], (b - mean) * scale + beta


def _folded_params(p):
    w1f, b1f = _fold_bn(p['w1'], p['b1'], p['g1'], p['be1'], p['m1'], p['v1'])
    w2f, b2f = _fold_bn(p['w2'], p['b2'], p['g2'], p['be2'], p['m2'], p['v2'])
    wdf, bdf = _fold_bn(p['wd'], p['bd'], p['gd'], p['bed'], p['md'], p['vd'])
    return (w1f, b1f), (w2f, b2f), (wdf, bdf)


def _build_band(w_hwio, w_in, w_out, stride):
    """Banded im2col weight matrices, shape (3, w_in*Cin, w_out*Cout).

    M[ky] maps a flattened input row (w_in*Cin lanes) to a flattened output
    row (w_out*Cout lanes); the W-direction zero padding (padding=1) and the
    kx taps are folded in as structural zeros/entries.
    """
    w_hwio = w_hwio.astype(jnp.float32)
    cin, cout = w_hwio.shape[2], w_hwio.shape[3]
    wi = jnp.arange(w_in)[:, None, None]          # (w_in, 1, 1)
    wo = jnp.arange(w_out)[None, :, None]         # (1, w_out, 1)
    kx = jnp.arange(3)[None, None, :]             # (1, 1, 3)
    sel = (wi == wo * stride + kx - 1).astype(jnp.float32)   # (w_in, w_out, 3)
    # m[ky, wi, ci, wo, co] = sum_kx sel[wi, wo, kx] * w[ky, kx, ci, co]
    m = jnp.einsum('wok,ykic->ywioc', sel, w_hwio,
                   precision=jax.lax.Precision.HIGHEST)
    return m.reshape(3, w_in * cin, w_out * cout)


def fastest_block(x_nchw, params, stride):
    assert stride > 1, "PyTorch FastestBlock forward only works for stride > 1"
    (w1f, b1f), (w2f, b2f), (wdf, bdf) = _folded_params(params)

    N, Cin, H, W = x_nchw.shape
    Ho = (H - 1) // stride + 1
    Wo = (W - 1) // stride + 1
    Cmid = w1f.shape[-1]
    Cout = w2f.shape[-1]

    # NCHW -> NHWC -> rows flattened to W*Cin on the lane dim.
    x = jnp.transpose(x_nchw, (0, 2, 3, 1)).astype(jnp.float32)
    x = x.reshape(N, H, W * Cin)

    # Banded weight matrices (constants w.r.t. the data, built once).
    m1 = _build_band(w1f, W, Wo, stride)      # (3, W*Cin,  Wo*Cmid)
    md = _build_band(wdf, W, Wo, stride)      # (3, W*Cin,  Wo*Cout)
    m2 = _build_band(w2f, Wo, Wo, 1)          # (3, Wo*Cmid, Wo*Cout)

    # Biases tiled over the output width (flattened index = wo*C + c).
    b1t = jnp.tile(b1f.astype(jnp.float32), Wo).reshape(1, Wo * Cmid)
    bdt = jnp.tile(bdf.astype(jnp.float32), Wo).reshape(1, Wo * Cout)
    b2t = jnp.tile(b2f.astype(jnp.float32), Wo).reshape(1, Wo * Cout)

    kernel = functools.partial(_fastest_block_kernel, stride=stride)
    out_flat = pl.pallas_call(
        kernel,
        out_shape=jax.ShapeDtypeStruct((N, Ho, Wo * Cout), jnp.float32),
        grid=(N,),
        in_specs=[
            pl.BlockSpec((1, H, W * Cin), lambda n: (n, 0, 0)),
            pl.BlockSpec((3, W * Cin, Wo * Cmid), lambda n: (0, 0, 0)),
            pl.BlockSpec((3, W * Cin, Wo * Cout), lambda n: (0, 0, 0)),
            pl.BlockSpec((3, Wo * Cmid, Wo * Cout), lambda n: (0, 0, 0)),
            pl.BlockSpec((1, Wo * Cmid), lambda n: (0, 0)),
            pl.BlockSpec((1, Wo * Cout), lambda n: (0, 0)),
            pl.BlockSpec((1, Wo * Cout), lambda n: (0, 0)),
        ],
        out_specs=pl.BlockSpec((1, Ho, Wo * Cout), lambda n: (n, 0, 0)),
        scratch_shapes=[
            pltpu.VMEM((H + 2, W * Cin), jnp.float32),
            pltpu.VMEM((Ho + 2, Wo * Cmid), jnp.float32),
        ],
        compiler_params=pltpu.CompilerParams(
            dimension_semantics=("parallel",)),
    )(x, m1, md, m2, b1t, bdt, b2t)

    out = out_flat.reshape(N, Ho, Wo, Cout)
    return jnp.transpose(out, (0, 3, 1, 2))   # back to NCHW


# ---------------------------------------------------------------------------
# Pure-JAX reference (for correctness check only).
# ---------------------------------------------------------------------------

def _reference(x_nchw, params, stride):
    (w1f, b1f), (w2f, b2f), (wdf, bdf) = _folded_params(params)
    x = jnp.transpose(x_nchw, (0, 2, 3, 1)).astype(jnp.float32)

    def conv(inp, wf, bf, s):
        y = jax.lax.conv_general_dilated(
            inp, wf, window_strides=(s, s), padding=((1, 1), (1, 1)),
            dimension_numbers=('NHWC', 'HWIO', 'NHWC'),
            precision=jax.lax.Precision.HIGHEST)
        return y + bf.reshape(1, 1, 1, -1)

    mid = jax.nn.relu(conv(x, w1f, b1f, stride))
    out = conv(mid, w2f, b2f, 1)
    identity = conv(x, wdf, bdf, stride)
    return jnp.transpose(jax.nn.relu(out + identity), (0, 3, 1, 2))


if __name__ == "__main__":
    in_channels, out_channels, stride = 4, 8, 2
    mid_channels = out_channels // 2
    N, H, W = 2, 16, 16

    key = jax.random.PRNGKey(0)
    ks = jax.random.split(key, 20)

    def normal(k, shape, s=0.1):
        return s * jax.random.normal(k, shape, jnp.float32)

    params = dict(
        # conv1: (mid, in, 3, 3)
        w1=normal(ks[0], (mid_channels, in_channels, 3, 3)),
        b1=normal(ks[1], (mid_channels,)),
        # norm1 parameterized over mid_channels (see note at top of file)
        g1=1.0 + normal(ks[2], (mid_channels,)),
        be1=normal(ks[3], (mid_channels,)),
        m1=normal(ks[4], (mid_channels,)),
        v1=1.0 + 0.2 * jax.random.uniform(ks[5], (mid_channels,), jnp.float32),
        # conv2: (out, mid, 3, 3)
        w2=normal(ks[6], (out_channels, mid_channels, 3, 3)),
        b2=normal(ks[7], (out_channels,)),
        g2=1.0 + normal(ks[8], (out_channels,)),
        be2=normal(ks[9], (out_channels,)),
        m2=normal(ks[10], (out_channels,)),
        v2=1.0 + 0.2 * jax.random.uniform(ks[11], (out_channels,), jnp.float32),
        # downsample conv: (out, in, 3, 3)
        wd=normal(ks[12], (out_channels, in_channels, 3, 3)),
        bd=normal(ks[13], (out_channels,)),
        gd=1.0 + normal(ks[14], (out_channels,)),
        bed=normal(ks[15], (out_channels,)),
        md=normal(ks[16], (out_channels,)),
        vd=1.0 + 0.2 * jax.random.uniform(ks[17], (out_channels,), jnp.float32),
    )

    x = jax.random.normal(ks[18], (N, in_channels, H, W), jnp.float32)

    out = jax.block_until_ready(fastest_block(x, params, stride))
    ref = jax.block_until_ready(_reference(x, params, stride))

    assert out.shape == (N, out_channels, H // stride, W // stride), out.shape
    max_err = float(jnp.max(jnp.abs(out - ref)))
    assert jnp.allclose(out, ref, atol=5e-4, rtol=5e-4), max_err

    print("KERNEL_OK")
</pallas_src>

<mosaic_0001>
module attributes {stable_mosaic.version = 11 : i64} {
  func.func @_fastest_block_kernel(%arg0: i32, %arg1: memref<1x16x64xf32, #tpu.memory_space<vmem>>, %arg2: memref<3x64x32xf32, #tpu.memory_space<vmem>>, %arg3: memref<3x64x64xf32, #tpu.memory_space<vmem>>, %arg4: memref<3x32x64xf32, #tpu.memory_space<vmem>>, %arg5: memref<1x32xf32, #tpu.memory_space<vmem>>, %arg6: memref<1x64xf32, #tpu.memory_space<vmem>>, %arg7: memref<1x64xf32, #tpu.memory_space<vmem>>, %arg8: memref<1x8x64xf32, #tpu.memory_space<vmem>>, %arg9: memref<18x64xf32, #tpu.memory_space<vmem>>, %arg10: memref<10x32xf32, #tpu.memory_space<vmem>>) attributes {dimension_semantics = [#tpu.dimension_semantics<parallel>], iteration_bounds = array<i64: 2>, scalar_prefetch = 0 : i64, scratch_operands = 2 : i64, tpu.core_type = #tpu.core_type<tc>, window_params = [{transform_indices = @transform_0, window_bounds = array<i64: 1, 16, 64>}, {pipeline_mode = #tpu.pipeline_mode<synchronous>, transform_indices = @transform_1, window_bounds = array<i64: 3, 64, 32>}, {pipeline_mode = #tpu.pipeline_mode<synchronous>, transform_indices = @transform_2, window_bounds = array<i64: 3, 64, 64>}, {pipeline_mode = #tpu.pipeline_mode<synchronous>, transform_indices = @transform_3, window_bounds = array<i64: 3, 32, 64>}, {pipeline_mode = #tpu.pipeline_mode<synchronous>, transform_indices = @transform_4, window_bounds = array<i64: 1, 32>}, {pipeline_mode = #tpu.pipeline_mode<synchronous>, transform_indices = @transform_5, window_bounds = array<i64: 1, 64>}, {pipeline_mode = #tpu.pipeline_mode<synchronous>, transform_indices = @transform_6, window_bounds = array<i64: 1, 64>}, {transform_indices = @transform_7, window_bounds = array<i64: 1, 8, 64>}]} {
    %cst = arith.constant 0.000000e+00 : f32
    %0 = vector.broadcast %cst : f32 to vector<1x64xf32>
    %c0 = arith.constant 0 : index
    %c0_0 = arith.constant 0 : index
    %1 = vector.load %arg9[%c0, %c0_0] : memref<18x64xf32, #tpu.memory_space<vmem>>, vector<1x64xf32>
    tpu.vector_store %arg9[%c0, %c0_0], %0 {strides = array<i32>} : memref<18x64xf32, #tpu.memory_space<vmem>>, vector<1x64xf32>,
    %cst_1 = arith.constant 0.000000e+00 : f32
    %2 = vector.broadcast %cst_1 : f32 to vector<1x64xf32>
    %c17 = arith.constant 17 : index
    %c0_2 = arith.constant 0 : index
    %3 = vector.load %arg9[%c17, %c0_2] : memref<18x64xf32, #tpu.memory_space<vmem>>, vector<1x64xf32>
    tpu.vector_store %arg9[%c17, %c0_2], %2 {strides = array<i32>} : memref<18x64xf32, #tpu.memory_space<vmem>>, vector<1x64xf32>,
    %c0_3 = arith.constant 0 : index
    %c0_4 = arith.constant 0 : index
    %c0_5 = arith.constant 0 : index
    %4 = vector.load %arg1[%c0_3, %c0_4, %c0_5] : memref<1x16x64xf32, #tpu.memory_space<vmem>>, vector<1x16x64xf32>
    %5 = vector.shape_cast %4 : vector<1x16x64xf32> to vector<16x64xf32>
    %c1 = arith.constant 1 : index
    %c0_6 = arith.constant 0 : index
    %6 = vector.load %arg9[%c1, %c0_6] : memref<18x64xf32, #tpu.memory_space<vmem>>, vector<16x64xf32>
    tpu.vector_store %arg9[%c1, %c0_6], %5 {strides = array<i32>} : memref<18x64xf32, #tpu.memory_space<vmem>>, vector<16x64xf32>,
    %c0_7 = arith.constant 0 : index
    %c0_8 = arith.constant 0 : index
    %7 = tpu.strided_load %arg9[%c0_7, %c0_8] {strides = array<i32: 2, 1>} : memref<18x64xf32, #tpu.memory_space<vmem>>, vector<8x64xf32>
    %c0_9 = arith.constant 0 : index
    %c0_10 = arith.constant 0 : index
    %c0_11 = arith.constant 0 : index
    %8 = vector.load %arg2[%c0_9, %c0_10, %c0_11] : memref<3x64x32xf32, #tpu.memory_space<vmem>>, vector<1x64x32xf32>
    %9 = vector.shape_cast %8 : vector<1x64x32xf32> to vector<64x32xf32>
    %cst_12 = arith.constant dense<0.000000e+00> : vector<8x32xf32>
    %10 = tpu.matmul %7, %9, %cst_12 {dimension_numbers = #tpu.dot_dimension_numbers<[1], [0], [0], [1], [0, 0, 1, 1], [], []>} : vector<8x64xf32>, vector<64x32xf32>, vector<8x32xf32> -> vector<8x32xf32>
    %c0_13 = arith.constant 0 : index
    %c0_14 = arith.constant 0 : index
    %11 = vector.load %arg5[%c0_13, %c0_14] : memref<1x32xf32, #tpu.memory_space<vmem>>, vector<1x32xf32>
    %12 = vector.broadcast %11 : vector<1x32xf32> to vector<8x32xf32>
    %13 = arith.addf %10, %12 : vector<8x32xf32>
    %c0_15 = arith.constant 0 : index
    %c0_16 = arith.constant 0 : index
    %c0_17 = arith.constant 0 : index
    %14 = vector.load %arg3[%c0_15, %c0_16, %c0_17] : memref<3x64x64xf32, #tpu.memory_space<vmem>>, vector<1x64x64xf32>
    %15 = vector.shape_cast %14 : vector<1x64x64xf32> to vector<64x64xf32>
    %cst_18 = arith.constant dense<0.000000e+00> : vector<8x64xf32>
    %16 = tpu.matmul %7, %15, %cst_18 {dimension_numbers = #tpu.dot_dimension_numbers<[1], [0], [0], [1], [0, 0, 1, 1], [], []>} : vector<8x64xf32>, vector<64x64xf32>, vector<8x64xf32> -> vector<8x64xf32>
    %c0_19 = arith.constant 0 : index
    %c0_20 = arith.constant 0 : index
    %17 = vector.load %arg6[%c0_19, %c0_20] : memref<1x64xf32, #tpu.memory_space<vmem>>, vector<1x64xf32>
    %18 = vector.broadcast %17 : vector<1x64xf32> to vector<8x64xf32>
    %19 = arith.addf %16, %18 : vector<8x64xf32>
    %c1_21 = arith.constant 1 : index
    %c0_22 = arith.constant 0 : index
    %20 = tpu.strided_load %arg9[%c1_21, %c0_22] {strides = array<i32: 2, 1>} : memref<18x64xf32, #tpu.memory_space<vmem>>, vector<8x64xf32>
    %c1_23 = arith.constant 1 : index
    %c0_24 = arith.constant 0 : index
    %c0_25 = arith.constant 0 : index
    %21 = vector.load %arg2[%c1_23, %c0_24, %c0_25] : memref<3x64x32xf32, #tpu.memory_space<vmem>>, vector<1x64x32xf32>
    %22 = vector.shape_cast %21 : vector<1x64x32xf32> to vector<64x32xf32>
    %cst_26 = arith.constant dense<0.000000e+00> : vector<8x32xf32>
    %23 = tpu.matmul %20, %22, %cst_26 {dimension_numbers = #tpu.dot_dimension_numbers<[1], [0], [0], [1], [0, 0, 1, 1], [], []>} : vector<8x64xf32>, vector<64x32xf32>, vector<8x32xf32> -> vector<8x32xf32>
    %24 = arith.addf %13, %23 : vector<8x32xf32>
    %c1_27 = arith.constant 1 : index
    %c0_28 = arith.constant 0 : index
    %c0_29 = arith.constant 0 : index
    %25 = vector.load %arg3[%c1_27, %c0_28, %c0_29] : memref<3x64x64xf32, #tpu.memory_space<vmem>>, vector<1x64x64xf32>
    %26 = vector.shape_cast %25 : vector<1x64x64xf32> to vector<64x64xf32>
    %cst_30 = arith.constant dense<0.000000e+00> : vector<8x64xf32>
    %27 = tpu.matmul %20, %26, %cst_30 {dimension_numbers = #tpu.dot_dimension_numbers<[1], [0], [0], [1], [0, 0, 1, 1], [], []>} : vector<8x64xf32>, vector<64x64xf32>, vector<8x64xf32> -> vector<8x64xf32>
    %28 = arith.addf %19, %27 : vector<8x64xf32>
    %c2 = arith.constant 2 : index
    %c0_31 = arith.constant 0 : index
    %29 = tpu.strided_load %arg9[%c2, %c0_31] {strides = array<i32: 2, 1>} : memref<18x64xf32, #tpu.memory_space<vmem>>, vector<8x64xf32>
    %c2_32 = arith.constant 2 : index
    %c0_33 = arith.constant 0 : index
    %c0_34 = arith.constant 0 : index
    %30 = vector.load %arg2[%c2_32, %c0_33, %c0_34] : memref<3x64x32xf32, #tpu.memory_space<vmem>>, vector<1x64x32xf32>
    %31 = vector.shape_cast %30 : vector<1x64x32xf32> to vector<64x32xf32>
    %cst_35 = arith.constant dense<0.000000e+00> : vector<8x32xf32>
    %32 = tpu.matmul %29, %31, %cst_35 {dimension_numbers = #tpu.dot_dimension_numbers<[1], [0], [0], [1], [0, 0, 1, 1], [], []>} : vector<8x64xf32>, vector<64x32xf32>, vector<8x32xf32> -> vector<8x32xf32>
    %33 = arith.addf %24, %32 : vector<8x32xf32>
    %c2_36 = arith.constant 2 : index
    %c0_37 = arith.constant 0 : index
    %c0_38 = arith.constant 0 : index
    %34 = vector.load %arg3[%c2_36, %c0_37, %c0_38] : memref<3x64x64xf32, #tpu.memory_space<vmem>>, vector<1x64x64xf32>
    %35 = vector.shape_cast %34 : vector<1x64x64xf32> to vector<64x64xf32>
    %cst_39 = arith.constant dense<0.000000e+00> : vector<8x64xf32>
    %36 = tpu.matmul %29, %35, %cst_39 {dimension_numbers = #tpu.dot_dimension_numbers<[1], [0], [0], [1], [0, 0, 1, 1], [], []>} : vector<8x64xf32>, vector<64x64xf32>, vector<8x64xf32> -> vector<8x64xf32>
    %37 = arith.addf %28, %36 : vector<8x64xf32>
    %cst_40 = arith.constant 0.000000e+00 : f32
    %38 = vector.broadcast %cst_40 : f32 to vector<8x32xf32>
    %39 = arith.maximumf %33, %38 : vector<8x32xf32>
    %cst_41 = arith.constant 0.000000e+00 : f32
    %40 = vector.broadcast %cst_41 : f32 to vector<1x32xf32>
    %c0_42 = arith.constant 0 : index
    %c0_43 = arith.constant 0 : index
    %41 = vector.load %arg10[%c0_42, %c0_43] : memref<10x32xf32, #tpu.memory_space<vmem>>, vector<1x32xf32>
    tpu.vector_store %arg10[%c0_42, %c0_43], %40 {strides = array<i32>} : memref<10x32xf32, #tpu.memory_space<vmem>>, vector<1x32xf32>,
    %cst_44 = arith.constant 0.000000e+00 : f32
    %42 = vector.broadcast %cst_44 : f32 to vector<1x32xf32>
    %c9 = arith.constant 9 : index
    %c0_45 = arith.constant 0 : index
    %43 = vector.load %arg10[%c9, %c0_45] : memref<10x32xf32, #tpu.memory_space<vmem>>, vector<1x32xf32>
    tpu.vector_store %arg10[%c9, %c0_45], %42 {strides = array<i32>} : memref<10x32xf32, #tpu.memory_space<vmem>>, vector<1x32xf32>,
    %c1_46 = arith.constant 1 : index
    %c0_47 = arith.constant 0 : index
    %44 = vector.load %arg10[%c1_46, %c0_47] : memref<10x32xf32, #tpu.memory_space<vmem>>, vector<8x32xf32>
    tpu.vector_store %arg10[%c1_46, %c0_47], %39 {strides = array<i32>} : memref<10x32xf32, #tpu.memory_space<vmem>>, vector<8x32xf32>,
    %c0_48 = arith.constant 0 : index
    %c0_49 = arith.constant 0 : index
    %45 = vector.load %arg10[%c0_48, %c0_49] : memref<10x32xf32, #tpu.memory_space<vmem>>, vector<8x32xf32>
    %c0_50 = arith.constant 0 : index
    %c0_51 = arith.constant 0 : index
    %c0_52 = arith.constant 0 : index
    %46 = vector.load %arg4[%c0_50, %c0_51, %c0_52] : memref<3x32x64xf32, #tpu.memory_space<vmem>>, vector<1x32x64xf32>
    %47 = vector.shape_cast %46 : vector<1x32x64xf32> to vector<32x64xf32>
    %cst_53 = arith.constant dense<0.000000e+00> : vector<8x64xf32>
    %48 = tpu.matmul %45, %47, %cst_53 {dimension_numbers = #tpu.dot_dimension_numbers<[1], [0], [0], [1], [0, 0, 1, 1], [], []>} : vector<8x32xf32>, vector<32x64xf32>, vector<8x64xf32> -> vector<8x64xf32>
    %c0_54 = arith.constant 0 : index
    %c0_55 = arith.constant 0 : index
    %49 = vector.load %arg7[%c0_54, %c0_55] : memref<1x64xf32, #tpu.memory_space<vmem>>, vector<1x64xf32>
    %50 = vector.broadcast %49 : vector<1x64xf32> to vector<8x64xf32>
    %51 = arith.addf %48, %50 : vector<8x64xf32>
    %c1_56 = arith.constant 1 : index
    %c0_57 = arith.constant 0 : index
    %52 = vector.load %arg10[%c1_56, %c0_57] : memref<10x32xf32, #tpu.memory_space<vmem>>, vector<8x32xf32>
    %c1_58 = arith.constant 1 : index
    %c0_59 = arith.constant 0 : index
    %c0_60 = arith.constant 0 : index
    %53 = vector.load %arg4[%c1_58, %c0_59, %c0_60] : memref<3x32x64xf32, #tpu.memory_space<vmem>>, vector<1x32x64xf32>
    %54 = vector.shape_cast %53 : vector<1x32x64xf32> to vector<32x64xf32>
    %cst_61 = arith.constant dense<0.000000e+00> : vector<8x64xf32>
    %55 = tpu.matmul %52, %54, %cst_61 {dimension_numbers = #tpu.dot_dimension_numbers<[1], [0], [0], [1], [0, 0, 1, 1], [], []>} : vector<8x32xf32>, vector<32x64xf32>, vector<8x64xf32> -> vector<8x64xf32>
    %56 = arith.addf %51, %55 : vector<8x64xf32>
    %c2_62 = arith.constant 2 : index
    %c0_63 = arith.constant 0 : index
    %57 = vector.load %arg10[%c2_62, %c0_63] : memref<10x32xf32, #tpu.memory_space<vmem>>, vector<8x32xf32>
    %c2_64 = arith.constant 2 : index
    %c0_65 = arith.constant 0 : index
    %c0_66 = arith.constant 0 : index
    %58 = vector.load %arg4[%c2_64, %c0_65, %c0_66] : memref<3x32x64xf32, #tpu.memory_space<vmem>>, vector<1x32x64xf32>
    %59 = vector.shape_cast %58 : vector<1x32x64xf32> to vector<32x64xf32>
    %cst_67 = arith.constant dense<0.000000e+00> : vector<8x64xf32>
    %60 = tpu.matmul %57, %59, %cst_67 {dimension_numbers = #tpu.dot_dimension_numbers<[1], [0], [0], [1], [0, 0, 1, 1], [], []>} : vector<8x32xf32>, vector<32x64xf32>, vector<8x64xf32> -> vector<8x64xf32>
    %61 = arith.addf %56, %60 : vector<8x64xf32>
    %62 = arith.addf %61, %37 : vector<8x64xf32>
    %cst_68 = arith.constant 0.000000e+00 : f32
    %63 = vector.broadcast %cst_68 : f32 to vector<8x64xf32>
    %64 = arith.maximumf %62, %63 : vector<8x64xf32>
    %c0_69 = arith.constant 0 : index
    %c0_70 = arith.constant 0 : index
    %c0_71 = arith.constant 0 : index
    %65 = vector.load %arg8[%c0_69, %c0_70, %c0_71] : memref<1x8x64xf32, #tpu.memory_space<vmem>>, vector<1x8x64xf32>
    %66 = vector.shape_cast %65 : vector<1x8x64xf32> to vector<8x64xf32>
    %67 = vector.shape_cast %64 : vector<8x64xf32> to vector<1x8x64xf32>
    tpu.vector_store %arg8[%c0_69, %c0_70, %c0_71], %67 {strides = array<i32>} : memref<1x8x64xf32, #tpu.memory_space<vmem>>, vector<1x8x64xf32>,
    return
  }
  func.func @transform_0(%arg0: i32) -> (i32, i32, i32) {
    %c0_i32 = arith.constant 0 : i32
    %c0_i32_0 = arith.constant 0 : i32
    %c0_i32_1 = arith.constant 0 : i32
    return %arg0, %c0_i32, %c0_i32_0 : i32, i32, i32
  }
  func.func @transform_1(%arg0: i32) -> (i32, i32, i32) {
    %c0_i32 = arith.constant 0 : i32
    %c0_i32_0 = arith.constant 0 : i32
    %c0_i32_1 = arith.constant 0 : i32
    %c0_i32_2 = arith.constant 0 : i32
    return %c0_i32, %c0_i32_0, %c0_i32_1 : i32, i32, i32
  }
  func.func @transform_2(%arg0: i32) -> (i32, i32, i32) {
    %c0_i32 = arith.constant 0 : i32
    %c0_i32_0 = arith.constant 0 : i32
    %c0_i32_1 = arith.constant 0 : i32
    %c0_i32_2 = arith.constant 0 : i32
    return %c0_i32, %c0_i32_0, %c0_i32_1 : i32, i32, i32
  }
  func.func @transform_3(%arg0: i32) -> (i32, i32, i32) {
    %c0_i32 = arith.constant 0 : i32
    %c0_i32_0 = arith.constant 0 : i32
    %c0_i32_1 = arith.constant 0 : i32
    %c0_i32_2 = arith.constant 0 : i32
    return %c0_i32, %c0_i32_0, %c0_i32_1 : i32, i32, i32
  }
  func.func @transform_4(%arg0: i32) -> (i32, i32) {
    %c0_i32 = arith.constant 0 : i32
    %c0_i32_0 = arith.constant 0 : i32
    %c0_i32_1 = arith.constant 0 : i32
    return %c0_i32, %c0_i32_0 : i32, i32
  }
  func.func @transform_5(%arg0: i32) -> (i32, i32) {
    %c0_i32 = arith.constant 0 : i32
    %c0_i32_0 = arith.constant 0 : i32
    %c0_i32_1 = arith.constant 0 : i32
    return %c0_i32, %c0_i32_0 : i32, i32
  }
  func.func @transform_6(%arg0: i32) -> (i32, i32) {
    %c0_i32 = arith.constant 0 : i32
    %c0_i32_0 = arith.constant 0 : i32
    %c0_i32_1 = arith.constant 0 : i32
    return %c0_i32, %c0_i32_0 : i32, i32
  }
  func.func @transform_7(%arg0: i32) -> (i32, i32, i32) {
    %c0_i32 = arith.constant 0 : i32
    %c0_i32_0 = arith.constant 0 : i32
    %c0_i32_1 = arith.constant 0 : i32
    return %arg0, %c0_i32, %c0_i32_0 : i32, i32, i32
  }
}

</mosaic_0001>

<bundles_post_ra>
// kernel: tpu_custom_call.1
= control target key start
LH: loop header
LB: loop body
LE: loop exit
PB: predicated region body
PF: predicated region fallthrough
CT: control target
= control target key end

     0   :  { %12 = vsyncpa [#allocation5], 0  ;;  %s2043_s0 = inlined_call_operand.hbm [shape: f32[2,16,64], index: 0, kind: input, shape index: {}]   ;;  %s2044_s1 = inlined_call_operand.vmem [shape: f32[3,64,32], index: 1, kind: input, shape index: {}]   ;;  %s2045_s2 = inlined_call_operand.vmem [shape: f32[3,64,64], index: 2, kind: input, shape index: {}]   ;;  %s2046_s3 = inlined_call_operand.vmem [shape: f32[3,32,64], index: 3, kind: input, shape index: {}]   ;;  %s2047_s4 = inlined_call_operand.vmem [shape: f32[1,32], index: 4, kind: input, shape index: {}]   ;;  %s2048_s5 = inlined_call_operand.vmem [shape: f32[1,64], index: 5, kind: input, shape index: {}]   ;;  %s2049_s6 = inlined_call_operand.vmem [shape: f32[1,64], index: 6, kind: input, shape index: {}]   ;;  %s2050_s7 = inlined_call_operand.hbm [shape: f32[2,8,64], index: 7, kind: output, shape index: {}]  }
   0x1   :  { %14 = vsyncpa [#allocation5 + $0x1], 0 }
   0x2   :  { %15 = vsyncpa [#allocation6], 0 }
   0x3   :  { %17 = vsyncpa [#allocation6 + $0x1], 0  ;;  %s1619_s24 = smov 0   ;;  %s1621_s25 = smov 0  }
   0x4   :  { %s1623_s26 = smov 0   ;;  %s1625_s27 = smov 0  }
   0x5 LB: > { %s1640_s28 = sadd.s32 4294967295, %s1571_s27   ;;  %s1147_s29 = sadd.s32 4294967294, %s1571_s27   ;;  %s1571_s27 = sphi %s1625_s27, %s2065_s27   ;;  %s1567_s26 = sphi %s1623_s26, %s2064_s26   ;;  %s1563_s25 = sphi %s1621_s25, %s2063_s25   ;;  %s1559_s24 = sphi %s1619_s24, %s2062_s24  }
   0x6   : > { %s1644_s30 = sadd.s32 1, %s1571_s27   ;;  %s30_s8 = sadd.s32 1, %s1567_s26 }
   0x7   : > { %s27_s9 = ssub.s32 %s1571_s27, %s1644_s30  ;;  %p37_p0 = scmp.ne.s32.totalorder %s1567_s26, %s1563_s25 }
   0x8   : > { %p28_p1 = scmp.eq.s32.totalorder %s27_s9, 0  ;;  %p38_p2 = scmp.eq.s32.totalorder %s1571_s27, 0 }
   0x9   : > { %p43_p3 = scmp.ne.s32.totalorder %s1563_s25, %s1559_s24  ;;  %p44_p4 = scmp.eq.s32.totalorder %s1640_s28, 0 }
   0xa   : > { %s1656_s10 = scalar_select %p28_p1, %s1567_s26, %s30_s8  }
   0xb   : > { %p1658_p5 = por %p38_p2, %p37_p0  ;;  %p1662_p6 = por %p44_p4, %p43_p3 }
   0xc   : > { %p193_p7 = scmp.eq.s32.totalorder %s1640_s28, 1  ;;  %p199_p8 = scmp.eq.s32.totalorder %s1147_s29, 1 }
   0xd   : > { %s2054_s12 = scalar_select %p1662_p6, 1, 0 }
   0xe   : > { %p1441_p10 = scmp.lt.s32.totalorder %s1571_s27, 2  ;;  %p1669_p11 = por %p193_p7, %p37_p0 }
   0xf   : > { %p1673_p12 = por %p199_p8, %p43_p3  ;;  %s237_s15 = sand.u32 1, %s1567_s26  }
  0x10   : > { %s2055_s13 = scalar_select %p1669_p11, 1, 0 }
  0x11   : > { %s2056_s14 = scalar_select %p1673_p12, 1, 0 }
  0x12   : > { %s1212_s16 = sshll.u32 %s1571_s27, 8  ;;  %s1150_s17 = sshll.u32 %s237_s15, 4 }
  0x13   : > { %s1682_s20 = scalar_lea.hbm %s2043_s0, %s1212_s16  ;;  %s241_s21 = scalar_lea.vmem [#allocation4], %s1150_s17 }
  0x14   : > { %s248_s22 = sshll.u32 %s241_s21, 4  ;;  %p1686_p13 = pnand %p1441_p10, %p1658_p5  ;;  %s1690_s22 = int_to_ptr.vmem [resolvable:$true] %s248_s22 }
  0x15   : > { %s1692_s29 = scalar_lea.sflag [#allocation5], %s237_s15  ;;  %s1479_s8 = scalar_lea.hbm %s1682_s20, 256 }
  0x16   : > { %p1480_p0 = scmp.ne.s32.totalorder %s1682_s20, %s1479_s8  ;;  %p1481_p1 = pneg %p1686_p13 }
  0x17   : > { %s1484_s17 = scalar_lea.hbm %s2043_s0, 512  ;;  %p1485_p4 = scmp.lt.s32.totalorder %s1682_s20, %s2043_s0 }
  0x18   : > { %p1482_p2 = pnand %p1481_p1, %p1480_p0  ;;  %p1486_p5 = scmp.lt.s32.totalorder %s1484_s17, %s1479_s8 }
  0x1a   : > { %p1483_p3 = pneg %p1482_p2  ;;  %p1487_p7 = por %p1486_p5, %p1485_p4 }
  0x1c   : > { %p1488_p8 = pnand %p1487_p7, %p1483_p3 }
  0x1e   : > { %1491 = shalt.err (!%p1488_p8)
}
  0x1f   : > { %s1492_s15 = scalar_lea.vmem %s1690_s22, 256  ;;  %s1573_s19 = smov [#allocation4]  }
  0x20   : > { %p1493_p10 = scmp.ne.s32.totalorder %s1690_s22, %s1492_s15  ;;  %s1497_s21 = sshll.u32 %s1573_s19, 4  ;;  %s1498_s21 = int_to_ptr.vmem [resolvable:$false] %s1497_s21 }
  0x21   : > { %s1499_s9 = scalar_lea.vmem %s1498_s21, 512  ;;  %p1500_p2 = scmp.lt.s32.totalorder %s1690_s22, %s1498_s21 }
  0x22   : > { %p1495_p9 = pnand %p1493_p10, %p1481_p1  ;;  %p1501_p12 = scmp.lt.s32.totalorder %s1499_s9, %s1492_s15 }
  0x24   : > { %p1496_p0 = pneg %p1495_p9  ;;  %p1502_p11 = por %p1501_p12, %p1500_p2 }
  0x26   : > { %p1503_p6 = pnand %p1502_p11, %p1496_p0 }
  0x28   : > { %1506 = shalt.err (!%p1503_p6)
}
  0x29   : > { %s1574_s8 = smov 128   ;;  %s1575_s16 = smov 8  }
  0x2a   : > { %1436 = dma.hbm_to_vmem [thread:$0]  (!%p1686_p13), %s1682_s20, 256, %s1690_s22, %s1692_s29, %s1574_s8, %s1574_s8, %s1575_s16  }
  0x2b   : > { %p1153_p9 = scmp.ge.s32.totalorder %s1571_s27, 1  ;;  %p256_p1 = scmp.lt.s32.totalorder %s1571_s27, 3 }
  0x2d   : > { %p257_p3 = pnand %p1153_p9, %p256_p1 }
  0x2e   : > { %s1716_s17 = sand.u32 (!%p257_p3), 1, %s1563_s25   ;;  %p2058_p6 = scmp.ne.s32.totalorder (!%p257_p3), %s2054_s12, 0 }
  0x2f   : > { %260 = sbr.rel (%p257_p3) target bundleno = 528 (0x210), region = 48  ;;  %s1154_s11 = sshll.u32 (!%p257_p3), %s1716_s17, 4 }
  0x30   : > { %s263_s18 = scalar_lea.sflag (!%p257_p3), [#allocation5], %s1716_s17  ;;  %s266_s15 = scalar_lea.vmem (!%p257_p3), [#allocation4], %s1154_s11 }
  0x34   : > { %1550 = dma.done.wait (%p2058_p6), %s263_s18, 256  }
  0x35   : > { %1552 = vsyncadd (%p2058_p6), %s263_s18, 4294967040  ;;  %vm297_vm0 = vcmask 516096   ;;  %v1576_v0 = vmov 0.0   ;;  %vm1577_vm1 = vmmov 0   ;;  %v313_v1 = vld [vmem:[%s2044_s1 + $0x38] sm:$0xff]  ;;  %v312_v2 = vld [vmem:[%s2044_s1 + $0x30] sm:$0xff] }
  0x36   : > { %1282 = vmatprep.subr.mxu0 %v1576_v0  ;;  %1298 = vmatprep.mubr.msk.f32.mxu0 %vm1577_vm1, %v1576_v0  ;;  %298 = vst.msk [vmem:[#allocation2] sm:$0x1] %vm297_vm0, %v1576_v0  ;;  %vm302_vm2 = vcmask 523264   ;;  %v311_v3 = vld [vmem:[%s2044_s1 + $0x28] sm:$0xff]  ;;  %v301_v5 = vld [vmem:[%s266_s15 + $0x8] sm:$0xff]  ;;  %v309_v7 = vld [vmem:[%s2044_s1 + $0x18] sm:$0xff] }
  0x37   : > { %1301 = vmatprep.subr.mxu1 %v1576_v0  ;;  %1317 = vmatprep.mubr.msk.f32.mxu1 %vm1577_vm1, %v1576_v0  ;;  %v300_v4 = vld [vmem:[%s266_s15] sm:$0xff]  ;;  %v310_v6 = vld [vmem:[%s2044_s1 + $0x20] sm:$0xff]  ;;  %304 = vst.msk [vmem:[#allocation2 + $0x9] sm:$0xff] %vm302_vm2, %v301_v5  ;;  %v308_v8 = vld [vmem:[%s2044_s1 + $0x10] sm:$0xff]  ;;  %vm810_vm3 = vcmask 253952   ;;  %vm813_vm4 = vcmask 261120  }
  0x38   : > { %1283 = vmatpush3.msra.mxu0 %v313_v1  ;;  %303 = vst.msk [vmem:[#allocation2 + $0x1] sm:$0xff] %vm302_vm2, %v300_v4  ;;  %v401_v9 = vld [vmem:[%s2045_s2 + $0x38] sm:$0xff]  ;;  %v400_v10 = vld [vmem:[%s2045_s2 + $0x30] sm:$0xff]  ;;  %v307_v11 = vld [vmem:[%s2044_s1 + $0x8] sm:$0xff]  ;;  %s1155_s16 = sshll.u32 %s1716_s17, 3  ;;  %s1209_s11 = sshll.u32 %s1640_s28, 7 }
  0x39   : > { %1284 = vmatprep.subr.mxu0 %v1576_v0  ;;  %1302 = vmatpush3.msra.mxu1 %v401_v9  ;;  %v399_v12 = vld [vmem:[%s2045_s2 + $0x28] sm:$0xff]  ;;  %v306_v13 = vld [vmem:[%s2044_s1] sm:$0xff]  ;;  %v1167_v16 = vld [vmem:[%s2044_s1 + $0x78] sm:$0xff]  ;;  %811 = vst.msk [vmem:[#allocation3] sm:$0x1] %vm810_vm3, %v1576_v0  ;;  %s296_s18 = scalar_lea.vmem [#allocation7], %s1155_s16  ;;  %s1075_s12 = scalar_lea.hbm %s2050_s7, %s1209_s11 }
  0x3a   : > { %1285 = vmatpush3.msra.mxu0 %v312_v2  ;;  %1303 = vmatprep.subr.mxu1 %v1576_v0  ;;  %v398_v14 = vld [vmem:[%s2045_s2 + $0x20] sm:$0xff]  ;;  %v1166_v17 = vld [vmem:[%s2044_s1 + $0x70] sm:$0xff]  ;;  %v397_v18 = vld [vmem:[%s2045_s2 + $0x18] sm:$0xff]  ;;  %812 = vst.msk [vmem:[#allocation3 + $0x9] sm:$0x1] %vm810_vm3, %v1576_v0  ;;  %s1077_s15 = sshll.u32 %s296_s18, 4  ;;  %s1078_s15 = int_to_ptr.vmem [resolvable:$true] %s1077_s15 }
  0x3b   : > { %1286 = vmatprep.subr.mxu0 %v1576_v0  ;;  %1304 = vmatpush3.msra.mxu1 %v400_v10  ;;  %v1165_v19 = vld [vmem:[%s2044_s1 + $0x68] sm:$0xff]  ;;  %v396_v20 = vld [vmem:[%s2045_s2 + $0x10] sm:$0xff]  ;;  %v1164_v21 = vld [vmem:[%s2044_s1 + $0x60] sm:$0xff]  ;;  %s1064_s23 = scalar_lea.sflag [#allocation6], %s1716_s17  ;;  %s1507_s29 = scalar_lea.vmem %s1078_s15, 128 }
  0x3c   : > { %1287 = vmatpush3.msra.mxu0 %v311_v3  ;;  %1305 = vmatprep.subr.mxu1 %v1576_v0  ;;  %v395_v22 = vld [vmem:[%s2045_s2 + $0x8] sm:$0xff]  ;;  %v1163_v23 = vld [vmem:[%s2044_s1 + $0x58] sm:$0xff]  ;;  %v394_v24 = vld [vmem:[%s2045_s2] sm:$0xff]  ;;  %p1508_p11 = scmp.ne.s32.totalorder %s1078_s15, %s1507_s29  ;;  %p2059_p12 = scmp.ne.s32.totalorder %s2055_s13, 0 }
  0x3d   : > { %1288 = vmatprep.subr.mxu0 %v1576_v0  ;;  %1306 = vmatpush3.msra.mxu1 %v399_v12  ;;  %v1162_v25 = vld [vmem:[%s2044_s1 + $0x50] sm:$0xff]  ;;  %v1176_v26 = vld [vmem:[%s2045_s2 + $0x78] sm:$0xff]  ;;  %v1161_v27 = vld [vmem:[%s2044_s1 + $0x48] sm:$0xff]  ;;  %s1578_s19 = smov [#allocation7]  }
  0x3e   : > { %1289 = vmatpush3.msra.mxu0 %v310_v6  ;;  %1307 = vmatprep.subr.mxu1 %v1576_v0  ;;  %v1175_v28 = vld [vmem:[%s2045_s2 + $0x70] sm:$0xff]  ;;  %v1160_v29 = vld [vmem:[%s2044_s1 + $0x40] sm:$0xff]  ;;  %v1185_v31 = vld [vmem:[%s2044_s1 + $0xb8] sm:$0xff]  ;;  %p1509_p13 = pnand %p1508_p11, %p2059_p12  ;;  %s1511_s21 = sshll.u32 %s1578_s19, 4  ;;  %s1512_s21 = int_to_ptr.vmem [resolvable:$false] %s1511_s21 }
  0x3f   : > { %1290 = vmatprep.subr.mxu0 %v1576_v0  ;;  %v305_v15 = vld [vmem:[#allocation2] ss:$2 sm:$0xff]  ;;  %1308 = vmatpush3.msra.mxu1 %v398_v14  ;;  %v480_v30 = vld [vmem:[#allocation2 + $0x1] ss:$2 sm:$0xff]  ;;  %v1184_v33 = vld [vmem:[%s2044_s1 + $0xb0] sm:$0xff]  ;;  %s1513_s28 = scalar_lea.vmem %s1512_s21, 256  ;;  %p1514_p5 = scmp.lt.s32.totalorder %s1078_s15, %s1512_s21 }
  0x40   : > { %1291 = vmatpush3.msra.mxu0 %v309_v7  ;;  %1309 = vmatprep.subr.mxu1 %v1576_v0  ;;  %v1174_v32 = vld [vmem:[%s2045_s2 + $0x68] sm:$0xff]  ;;  %v1173_v34 = vld [vmem:[%s2045_s2 + $0x60] sm:$0xff]  ;;  %v1172_v36 = vld [vmem:[%s2045_s2 + $0x58] sm:$0xff]  ;;  %p1510_p4 = pneg %p1509_p13  ;;  %p1515_p7 = scmp.lt.s32.totalorder %s1513_s28, %s1507_s29 }
  0x41   : > { %1292 = vmatprep.subr.mxu0 %v1576_v0  ;;  %1310 = vmatpush3.msra.mxu1 %v397_v18  ;;  %v1183_v35 = vld [vmem:[%s2044_s1 + $0xa8] sm:$0xff]  ;;  %v1182_v37 = vld [vmem:[%s2044_s1 + $0xa0] sm:$0xff]  ;;  %v1171_v38 = vld [vmem:[%s2045_s2 + $0x50] sm:$0xff] }
  0x42   : > { %1293 = vmatpush3.msra.mxu0 %v308_v8  ;;  %1311 = vmatprep.subr.mxu1 %v1576_v0  ;;  %v1181_v39 = vld [vmem:[%s2044_s1 + $0x98] sm:$0xff]  ;;  %v1170_v40 = vld [vmem:[%s2045_s2 + $0x48] sm:$0xff]  ;;  %v1180_v41 = vld [vmem:[%s2044_s1 + $0x90] sm:$0xff]  ;;  %p1516_p8 = por %p1515_p7, %p1514_p5 }
  0x43   : > { %1294 = vmatprep.subr.mxu0 %v1576_v0  ;;  %1312 = vmatpush3.msra.mxu1 %v396_v20  ;;  %v1169_v42 = vld [vmem:[%s2045_s2 + $0x40] sm:$0xff]  ;;  %v1179_v43 = vld [vmem:[%s2044_s1 + $0x88] sm:$0xff]  ;;  %v1194_v46 = vld [vmem:[%s2045_s2 + $0xb8] sm:$0xff] }
  0x44   : > { %1295 = vmatpush3.msra.mxu0 %v307_v11  ;;  %1313 = vmatprep.subr.mxu1 %v1576_v0  ;;  %v1178_v44 = vld [vmem:[%s2044_s1 + $0x80] sm:$0xff]  ;;  %v1193_v47 = vld [vmem:[%s2045_s2 + $0xb0] sm:$0xff]  ;;  %v1192_v48 = vld [vmem:[%s2045_s2 + $0xa8] sm:$0xff]  ;;  %p1517_p10 = pnand %p1516_p8, %p1510_p4 }
  0x45   : > { %1296 = vmatprep.subr.mxu0 %v1576_v0  ;;  %1314 = vmatpush3.msra.mxu1 %v395_v22  ;;  %v645_v45 = vld [vmem:[#allocation2 + $0x2] ss:$2 sm:$0xff]  ;;  %v1190_v50 = vld [vmem:[%s2045_s2 + $0x98] sm:$0xff]  ;;  %v1158_v5 = vld [vmem:[%s2048_s5] ss:$0 sm:$0xff] }
  0x46   : > { %1297 = vmatpush3.msra.mxu0 %v306_v13  ;;  %1315 = vmatprep.subr.mxu1 %v1576_v0  ;;  %v1191_v49 = vld [vmem:[%s2045_s2 + $0xa0] sm:$0xff]  ;;  %v1189_v51 = vld [vmem:[%s2045_s2 + $0x90] sm:$0xff]  ;;  %v1188_v52 = vld [vmem:[%s2045_s2 + $0x88] sm:$0xff] }
  0x47   : > { %1299 = vmatmul.mubr.msk.f32.vlgmr.msra.gmra.mxu0 %vm302_vm2, %v305_v15  ;;  %1320 = vmatprep.subr.mxu0 %v1576_v0  ;;  %v1187_v53 = vld [vmem:[%s2045_s2 + $0x80] sm:$0xff]  ;;  %v819_v54 = vld [vmem:[%s2046_s3 + $0x18] sm:$0xff]  ;;  %v818_v56 = vld [vmem:[%s2046_s3 + $0x10] sm:$0xff] }
  0x48   : > { %1321 = vmatpush3.msra.mxu0 %v1167_v16  ;;  %1336 = vmatprep.mubr.msk.f32.mxu0 %vm1577_vm1, %v1576_v0  ;;  %v1201_v55 = vld [vmem:[%s2046_s3 + $0x38] sm:$0xff]  ;;  %v1200_v57 = vld [vmem:[%s2046_s3 + $0x30] sm:$0xff]  ;;  %v817_v58 = vld [vmem:[%s2046_s3 + $0x8] sm:$0xff] }
  0x49   : > { %1322 = vmatprep.subr.mxu0 %v1576_v0  ;;  %1316 = vmatpush3.msra.mxu1 %v394_v24  ;;  %v1199_v59 = vld [vmem:[%s2046_s3 + $0x28] sm:$0xff]  ;;  %v816_v60 = vld [vmem:[%s2046_s3] sm:$0xff]  ;;  %v1205_v20 = vld [vmem:[%s2046_s3 + $0x50] sm:$0xff] }
  0x4a   : > { %1323 = vmatpush3.msra.mxu0 %v1166_v17  ;;  %1339 = vmatprep.subr.mxu1 %v1576_v0  ;;  %v1198_v61 = vld [vmem:[%s2046_s3 + $0x20] sm:$0xff]  ;;  %v1206_v17 = vld [vmem:[%s2046_s3 + $0x58] sm:$0xff] }
  0x4b   : > { %1324 = vmatprep.subr.mxu0 %v1576_v0  ;;  %1318 = vmatmul.mubr.msk.f32.vlgmr.msra.gmra.mxu1 %vm302_vm2, %v305_v15  ;;  %v1156_v6 = vld [vmem:[%s2047_s4] ss:$0 sm:$0xff] }
  0x4c   : > { %1325 = vmatpush3.msra.mxu0 %v1165_v19  ;;  %1340 = vmatpush3.msra.mxu1 %v1176_v26  ;;  %v1203_v22 = vld [vmem:[%s2046_s3 + $0x40] sm:$0xff] }
  0x4d   : > { %1326 = vmatprep.subr.mxu0 %v1576_v0  ;;  %1341 = vmatprep.subr.mxu1 %v1576_v0 }
  0x4e   : > { %1327 = vmatpush3.msra.mxu0 %v1164_v21  ;;  %1342 = vmatpush3.msra.mxu1 %v1175_v28  ;;  %v1204_v21 = vld [vmem:[%s2046_s3 + $0x48] sm:$0xff] }
  0x4f   : > { %1328 = vmatprep.subr.mxu0 %v1576_v0  ;;  %1343 = vmatprep.subr.mxu1 %v1576_v0 }
  0x50   : > { %1329 = vmatpush3.msra.mxu0 %v1163_v23  ;;  %1344 = vmatpush3.msra.mxu1 %v1174_v32 }
  0x51   : > { %1330 = vmatprep.subr.mxu0 %v1576_v0  ;;  %1345 = vmatprep.subr.mxu1 %v1576_v0 }
  0x52   : > { %1331 = vmatpush3.msra.mxu0 %v1162_v25  ;;  %1346 = vmatpush3.msra.mxu1 %v1173_v34 }
  0x53   : > { %1332 = vmatprep.subr.mxu0 %v1576_v0  ;;  %1347 = vmatprep.subr.mxu1 %v1576_v0 }
  0x54   : > { %1333 = vmatpush3.msra.mxu0 %v1161_v27  ;;  %1348 = vmatpush3.msra.mxu1 %v1172_v36  ;;  %v1196_v27 = vld [vmem:[%s2049_s6] ss:$0 sm:$0xff] }
  0x55   : > { %1334 = vmatprep.subr.mxu0 %v1576_v0  ;;  %1349 = vmatprep.subr.mxu1 %v1576_v0 }
  0x56   : > { %1335 = vmatpush3.msra.mxu0 %v1160_v29  ;;  %1350 = vmatpush3.msra.mxu1 %v1171_v38 }
  0x57   : > { %1337 = vmatmul.mubr.msk.f32.vlgmr.msra.gmra.mxu0 %vm302_vm2, %v480_v30  ;;  %1358 = vmatprep.subr.mxu0 %v1576_v0 }
  0x58   : > { %1359 = vmatpush3.msra.mxu0 %v1185_v31  ;;  %1374 = vmatprep.mubr.msk.f32.mxu0 %vm1577_vm1, %v1576_v0 }
  0x59   : > { %1360 = vmatprep.subr.mxu0 %v1576_v0  ;;  %1351 = vmatprep.subr.mxu1 %v1576_v0 }
  0x5a   : > { %1361 = vmatpush3.msra.mxu0 %v1184_v33  ;;  %1352 = vmatpush3.msra.mxu1 %v1170_v40 }
  0x5b   : > { %1362 = vmatprep.subr.mxu0 %v1576_v0  ;;  %1353 = vmatprep.subr.mxu1 %v1576_v0 }
  0x5c   : > { %1363 = vmatpush3.msra.mxu0 %v1183_v35  ;;  %1354 = vmatpush3.msra.mxu1 %v1169_v42 }
  0x5d   : > { %1364 = vmatprep.subr.mxu0 %v1576_v0  ;;  %1355 = vmatprep.mubr.msk.f32.mxu1 %vm1577_vm1, %v1576_v0 }
  0x5e   : > { %1365 = vmatpush3.msra.mxu0 %v1182_v37  ;;  %1377 = vmatprep.subr.mxu1 %v1576_v0 }
  0x5f   : > { %1366 = vmatprep.subr.mxu0 %v1576_v0  ;;  %1356 = vmatmul.mubr.msk.f32.vlgmr.msra.gmra.mxu1 %vm302_vm2, %v480_v30 }
  0x60   : > { %1367 = vmatpush3.msra.mxu0 %v1181_v39  ;;  %1393 = vmatprep.mubr.msk.f32.mxu1 %vm1577_vm1, %v1576_v0 }
  0x61   : > { %1368 = vmatprep.subr.mxu0 %v1576_v0  ;;  %1378 = vmatpush3.msra.mxu1 %v1194_v46 }
  0x62   : > { %1369 = vmatpush3.msra.mxu0 %v1180_v41  ;;  %1379 = vmatprep.subr.mxu1 %v1576_v0 }
  0x63   : > { %1370 = vmatprep.subr.mxu0 %v1576_v0  ;;  %1380 = vmatpush3.msra.mxu1 %v1193_v47 }
  0x64   : > { %1371 = vmatpush3.msra.mxu0 %v1179_v43  ;;  %1381 = vmatprep.subr.mxu1 %v1576_v0 }
  0x65   : > { %1372 = vmatprep.subr.mxu0 %v1576_v0  ;;  %1382 = vmatpush3.msra.mxu1 %v1192_v48 }
  0x66   : > { %1373 = vmatpush3.msra.mxu0 %v1178_v44  ;;  %1383 = vmatprep.subr.mxu1 %v1576_v0 }
  0x67   : > { %1375 = vmatmul.mubr.msk.f32.vlgmr.msra.gmra.mxu0 %vm302_vm2, %v645_v45  ;;  %1396 = vmatprep.subr.mxu0 %v1576_v0 }
  0x68   : > { %1404 = vmatprep.mubr.msk.f32.mxu0 %vm1577_vm1, %v1576_v0  ;;  %1384 = vmatpush3.msra.mxu1 %v1191_v49 }
  0x69   : > { %1385 = vmatprep.subr.mxu1 %v1576_v0  ;;  %1397 = vmatpush3.msra.mxu0 %v819_v54 }
  0x6a   : > { %1386 = vmatpush3.msra.mxu1 %v1190_v50  ;;  %1398 = vmatprep.subr.mxu0 %v1576_v0 }
  0x6b   : > { %1387 = vmatprep.subr.mxu1 %v1576_v0  ;;  %1399 = vmatpush3.msra.mxu0 %v818_v56 }
  0x6c   : > { %1388 = vmatpush3.msra.mxu1 %v1189_v51  ;;  %1400 = vmatprep.subr.mxu0 %v1576_v0 }
  0x6d   : > { %1389 = vmatprep.subr.mxu1 %v1576_v0  ;;  %1401 = vmatpush3.msra.mxu0 %v817_v58 }
  0x6e   : > { %1390 = vmatpush3.msra.mxu1 %v1188_v52  ;;  %1402 = vmatprep.subr.mxu0 %v1576_v0 }
  0x6f   : > { %1391 = vmatprep.subr.mxu1 %v1576_v0  ;;  %1403 = vmatpush3.msra.mxu0 %v816_v60 }
  0x70   : > { %1392 = vmatpush3.msra.mxu1 %v1187_v53  ;;  %1418 = vmatprep.subr.mxu0 %v1576_v0 }
  0x71   : > { %1394 = vmatmul.mubr.msk.f32.vlgmr.msra.gmra.mxu1 %vm302_vm2, %v645_v45  ;;  %1407 = vmatprep.subr.mxu1 %v1576_v0 }
  0x72   : > { %1415 = vmatprep.mubr.msk.f32.mxu1 %vm1577_vm1, %v1576_v0  ;;  %1408 = vmatpush3.msra.mxu1 %v1201_v55 }
  0x73   : > { %1409 = vmatprep.subr.mxu1 %v1576_v0 }
  0x74   : > { %1410 = vmatpush3.msra.mxu1 %v1200_v57 }
  0x75   : > { %1411 = vmatprep.subr.mxu1 %v1576_v0 }
  0x76   : > { %1412 = vmatpush3.msra.mxu1 %v1199_v59 }
  0x77   : > { %1413 = vmatprep.subr.mxu1 %v1576_v0 }
  0x78   : > { %1414 = vmatpush3.msra.mxu1 %v1198_v61 }
 0x107   : > { %v390_v62 = vpop.f32.mrf.mxu0 }
 0x108   : > { %v391_v8 = vadd.f32 %v1156_v6, %v390_v62 }
 0x109   : > { %v1300_v63 = vpop.f32.mrf.mxu0 }
 0x10b   : > { %v475_v1 = vpop.f32.mrf.mxu1 }
 0x10c   : > { %v476_v7 = vadd.f32 %v1158_v5, %v475_v1 }
 0x10d   : > { %v1319_v2 = vpop.f32.mrf.mxu1 }
 0x117   : > { %v559_v3 = vpop.f32.mrf.mxu0 }
 0x118   : > { %v563_v9 = vadd.f32 %v559_v3, %v391_v8 }
 0x119   : > { %v1338_v4 = vpop.f32.mrf.mxu0 }
 0x11f   : > { %v639_v10 = vpop.f32.mrf.mxu1 }
 0x120   : > { %v643_v12 = vadd.f32 %v639_v10, %v476_v7 }
 0x121   : > { %v1357_v14 = vpop.f32.mrf.mxu1 }
 0x127   : > { %v724_v11 = vpop.f32.mrf.mxu0 }
 0x128   : > { %v728_v13 = vadd.f32 %v724_v11, %v563_v9 }
 0x129   : > { %v1376_v15 = vpop.f32.mrf.mxu0 }
 0x12a   : > { %v809_v16 = vmax.f32 %v728_v13, 0.0 }
 0x12c   : > { %814 = vst.msk [vmem:[#allocation3 + $0x1] sm:$0xff] %vm813_vm4, %v809_v16 }
 0x131   : > { %v804_v24 = vpop.f32.mrf.mxu1 }
 0x132   : > { %v808_v25 = vadd.f32 %v804_v24, %v643_v12 }
 0x133   : > { %v815_v18 = vld [vmem:[#allocation3] sm:$0xff]  ;;  %v1395_v26 = vpop.f32.mrf.mxu1 }
 0x134   : > { %v900_v19 = vld [vmem:[#allocation3 + $0x1] sm:$0xff]  ;;  %1405 = vmatmul.mubr.msk.f32.vlgmr.msra.gmra.mxu0 %vm813_vm4, %v815_v18 }
 0x135   : > { %1416 = vmatmul.mubr.msk.f32.vlgmr.msra.gmra.mxu1 %vm813_vm4, %v900_v19  ;;  %1419 = vmatpush3.msra.mxu0 %v1206_v17  ;;  %v980_v23 = vld [vmem:[#allocation3 + $0x2] sm:$0xff] }
 0x136   : > { %1426 = vmatprep.mubr.msk.f32.mxu0 %vm1577_vm1, %v1576_v0  ;;  %1420 = vmatprep.subr.mxu0 %v1576_v0 }
 0x137   : > { %1421 = vmatpush3.msra.mxu0 %v1205_v20 }
 0x138   : > { %1422 = vmatprep.subr.mxu0 %v1576_v0 }
 0x139   : > { %1423 = vmatpush3.msra.mxu0 %v1204_v21 }
 0x13a   : > { %1424 = vmatprep.subr.mxu0 %v1576_v0 }
 0x13b   : > { %1425 = vmatpush3.msra.mxu0 %v1203_v22 }
 0x13c   : > { %1427 = vmatmul.mubr.msk.f32.vlgmr.msra.gmra.mxu0 %vm813_vm4, %v980_v23 }
 0x1f4   : > { %v896_v28 = vpop.f32.mrf.mxu0 }
 0x1f5   : > { %v975_v29 = vpop.f32.mrf.mxu1  ;;  %v897_v32 = vadd.f32 %v1196_v27, %v896_v28 }
 0x1f6   : > { %v1406_v30 = vpop.f32.mrf.mxu0 }
 0x1f7   : > { %v1417_v31 = vpop.f32.mrf.mxu1  ;;  %v979_v0 = vadd.f32 %v975_v29, %v897_v32 }
 0x1fc   : > { %v1055_v33 = vpop.f32.mrf.mxu0 }
 0x1fd   : > { %v1059_v34 = vadd.f32 %v1055_v33, %v979_v0 }
 0x1fe   : > { %v1428_v35 = vpop.f32.mrf.mxu0 }
 0x1ff   : > { %v1060_v36 = vadd.f32 %v1059_v34, %v808_v25 }
 0x201   : > { %v1061_v37 = vmax.f32 %v1060_v36, 0.0 }
 0x203   : > { %1062 = vst.msk [vmem:[%s296_s18] sm:$0xff] %vm302_vm2, %v1061_v37 }
 0x204   : > { %1520 = shalt.err (!%p1517_p10)
}
 0x205   : > { %s1521_s9 = scalar_lea.hbm %s1075_s12, 128  ;;  %s1525_s16 = scalar_lea.hbm %s2050_s7, 256 }
 0x206   : > { %p1522_p0 = scmp.ne.s32.totalorder %s1075_s12, %s1521_s9  ;;  %p1526_p1 = scmp.lt.s32.totalorder %s1075_s12, %s2050_s7 }
 0x207   : > { %p1527_p3 = scmp.lt.s32.totalorder %s1525_s16, %s1521_s9 }
 0x208   : > { %p1523_p2 = pnand %p1522_p0, %p2059_p12 }
 0x209   : > { %p1528_p6 = por %p1527_p3, %p1526_p1 }
 0x20a   : > { %p1524_p9 = pneg %p1523_p2 }
 0x20c   : > { %p1529_p11 = pnand %p1528_p6, %p1524_p9 }
 0x20e   : > { %1532 = shalt.err (!%p1529_p11)
}
 0x20f   : > { %1431 = dma.vmem_to_hbm [thread:$0]  (%p2059_p12), %s1078_s15, 128, %s1075_s12, %s1064_s23  }
 0x210 PF: > { %s1089_s20 = sand.u32 1, %s1559_s24   ;;  %p2060_p13 = scmp.ne.s32.totalorder %s2056_s14, 0 }
 0x211   : > { %p2061_p4 = scmp.ge.s32.totalorder %s1571_s27, 2  ;;  %s1090_s22 = scalar_lea.sflag [#allocation6], %s1089_s20 }
 0x213   : > { %p1438_p5 = pnand %p2061_p4, %p2060_p13 }
 0x215   : > { %p1439_p7 = pneg %p1438_p5 }
 0x217   : > { %1554 = dma.done.wait (%p1439_p7), %s1090_s22, 128  }
 0x218   : > { %1556 = vsyncadd (%p1439_p7), %s1090_s22, 4294967168  ;;  %p20_p8 = scmp.ge.s32.totalorder %s1644_s30, 4   ;;  %s2062_s24 = smov %s1563_s25 }
 0x219   : > { %s2063_s25 = smov %s1567_s26  ;;  %s2064_s26 = smov %s1656_s10 }
 0x21a   : > { %s2065_s27 = smov %s1644_s30  ;;  %22 = sbr.rel (!%p20_p8) target bundleno = 5 (0x5), region = 101 }
 0x21f   :  { %1095 = vsyncpa [#allocation5], 1 }
 0x220   :  { %1097 = vsyncpa [#allocation5 + $0x1], 1 }
 0x221   :  { %1098 = vsyncpa [#allocation6], 1 }
 0x222   :  { %1100 = vsyncpa [#allocation6 + $0x1], 1 }

</bundles_post_ra>
